<compile_context>
chip_gen: v7x
topology: tpu7x:2x2x1
jax: 0.10.0
libtpu: 0.0.40
codegen_flags: <defaults>
</compile_context>

<pallas_src>
import jax
import jax.numpy as jnp
from jax.experimental import pallas as pl
from jax.experimental.pallas import tpu as pltpu


# --------------------------------------------------------------------------- #
# Kernel
# --------------------------------------------------------------------------- #
def _make_cde_kernel(I, H, Tt, dt):
    """Builds the kernel for one (time-block, batch-block) grid step."""
    unroll = max(1, min(4, Tt - 1))

    def kernel(x_ref, win_ref, bin_ref, w1_ref, w1t_ref, b1_ref,
               w2_ref, b2_ref, w3_ref, b3_ref, out_ref, z_sc, xp_sc):
        # grid = (batch_blocks, time_blocks): axis 1 is the sequential time axis.
        jt = pl.program_id(1)
        t_base = jt * Tt                       # global output row of local row 0

        # ---- hoist loop-invariant weight / bias reads ------------------------
        w_in = win_ref[...]
        b_in = bin_ref[...]
        w1 = w1_ref[...]
        w1t = w1t_ref[...]
        b1 = b1_ref[...]
        w2 = w2_ref[...]
        b2 = b2_ref[...]
        w3 = w3_ref[...]                       # fused (H, I*H)
        b3 = b3_ref[...]                       # (1, I*H)
        cdt = w1.dtype                         # matmul operand dtype (f32 / bf16)

        def euler_step(z, x_s, x_s1, s):
            # s is the global step index; t = s / (T-1).
            t = s.astype(jnp.float32) * dt
            # Linear(H+1 -> H) with the time channel folded in:
            #   concat(z, t) @ W1.T == z @ W1[:, :H].T + t * W1[:, H]
            h = (jnp.dot(z.astype(cdt), w1, preferred_element_type=jnp.float32)
                 + (b1 + t * w1t))
            h = jnp.maximum(h, 0.0)            # ReLU
            h = jnp.maximum(
                jnp.dot(h.astype(cdt), w2, preferred_element_type=jnp.float32) + b2,
                0.0)                           # ReLU
            # Fused integrand: F_flat[:, i*H + h_out] = tanh(Linear(H -> H*I)).
            F = jnp.tanh(
                jnp.dot(h.astype(cdt), w3, preferred_element_type=jnp.float32) + b3)
            dX = x_s1 - x_s                    # (Bt, I)
            z_new = z
            for i in range(I):                 # static lane slices + broadcasts
                z_new = z_new + F[:, i * H:(i + 1) * H] * dX[:, i:i + 1]
            return z_new

        # ---- local row 0 of this time block ----------------------------------
        @pl.when(jt == 0)
        def _():
            # z0 = input_layer(x[:, 0, :])
            z0 = (jnp.dot(x_ref[0].astype(cdt), w_in,
                          preferred_element_type=jnp.float32) + b_in)
            z_sc[...] = z0
            out_ref[0] = z0

        @pl.when(jt > 0)
        def _():
            # First step of this block uses the x halo carried from the previous
            # block (global step s = jt*Tt - 1).
            s = t_base - 1
            z_new = euler_step(z_sc[...], xp_sc[...], x_ref[0], s)
            z_sc[...] = z_new
            out_ref[0] = z_new

        # ---- local rows 1 .. Tt-1 ---------------------------------------------
        def body(r, z):
            s = t_base + r - 1
            z_new = euler_step(z, x_ref[r - 1], x_ref[r], s)
            out_ref[r] = z_new
            return z_new

        z_fin = jax.lax.fori_loop(1, Tt, body, z_sc[...], unroll=unroll)

        # carry state + x halo into the next time block
        z_sc[...] = z_fin
        xp_sc[...] = x_ref[Tt - 1]

    return kernel


# --------------------------------------------------------------------------- #
# Wrapper
# --------------------------------------------------------------------------- #
def _pick_bt(B, target=128):
    """Batch block: multiple of 8 dividing B (sublane tile), else full B."""
    if B % 8 != 0:
        return B
    bt = min(B, max(8, (target // 8) * 8))
    while bt > 8 and B % bt != 0:
        bt -= 8
    return bt if B % bt == 0 else B


def _largest_divisor_leq(n, target):
    d = min(n, target)
    while n % d != 0:
        d -= 1
    return d


def neural_cde_forward(x, torch_params, *, bt=None, tt=None, use_bf16=None):
    """x: (B, T, I) float32. torch_params: dict of PyTorch-layout weights."""
    B, T, I = x.shape
    assert T > 1, "only the multi-step (T > 1) branch is implemented"

    W_in, b_in = torch_params["W_in"], torch_params["b_in"]
    W1, b1 = torch_params["W1"], torch_params["b1"]
    W2, b2 = torch_params["W2"], torch_params["b2"]
    W3, b3 = torch_params["W3"], torch_params["b3"]
    H = W_in.shape[0]

    # bf16 MXU operands only pay off at larger H; keep f32 for toy sizes.
    if use_bf16 is None:
        use_bf16 = H >= 128
    cdt = jnp.bfloat16 if use_bf16 else jnp.float32

    if bt is None:
        bt = _pick_bt(B)
    if tt is None:
        tt = _largest_divisor_leq(T, 128)
    assert B % bt == 0 and (bt % 8 == 0 or bt == B), (B, bt)
    assert T % tt == 0, (T, tt)

    # ---- glue: repack PyTorch (out, in) weights for x @ W style matmuls -------
    w_in = W_in.T.astype(cdt)                           # (I, H)
    b_in_r = b_in.reshape(1, H).astype(jnp.float32)
    w1 = W1[:, :H].T.astype(cdt)                        # (H, H) hidden part
    w1t = W1[:, H].reshape(1, H).astype(jnp.float32)    # time-channel column
    b1_r = b1.reshape(1, H).astype(jnp.float32)
    w2 = W2.T.astype(cdt)                               # (H, H)
    b2_r = b2.reshape(1, H).astype(jnp.float32)
    # Fused W3: PyTorch row j = h_out*I + i  ->  column c = i*H + h_out.
    w3f = jnp.transpose(W3.reshape(H, I, H), (2, 1, 0)).reshape(H, I * H).astype(cdt)
    b3f = b3.reshape(H, I).T.reshape(1, I * H).astype(jnp.float32)

    x_t = jnp.transpose(x, (1, 0, 2)).astype(jnp.float32)   # time-major (T, B, I)

    dt = 1.0 / (T - 1)
    kernel = _make_cde_kernel(I, H, tt, dt)

    grid = (B // bt, T // tt)                    # (parallel batch, sequential time)
    x_spec = pl.BlockSpec((tt, bt, I), lambda jb, jt: (jt, jb, 0))
    out_spec = pl.BlockSpec((tt, bt, H), lambda jb, jt: (jt, jb, 0))
    weights = (w_in, b_in_r, w1, w1t, b1_r, w2, b2_r, w3f, b3f)
    # Weights: full-shape blocks with a constant index -> stay VMEM-resident.
    w_specs = [pl.BlockSpec(w.shape, lambda jb, jt: (0, 0)) for w in weights]

    # Explicit VMEM budget from the chosen block sizes (keeps v7x's 64 MiB happy).
    w_bytes = sum(int(w.size) * w.dtype.itemsize for w in weights)
    blk_bytes = 2 * (tt * bt * I + tt * bt * H) * 4      # double-buffered x/out
    scr_bytes = (bt * H + bt * I) * 4
    vmem_limit = int(min(max(2 * (w_bytes + blk_bytes + scr_bytes) + (1 << 20),
                             16 << 20), 48 << 20))

    out_tbh = pl.pallas_call(
        kernel,
        out_shape=jax.ShapeDtypeStruct((T, B, H), jnp.float32),
        grid_spec=pltpu.PrefetchScalarGridSpec(
            num_scalar_prefetch=0,
            grid=grid,
            in_specs=[x_spec] + w_specs,
            out_specs=out_spec,
            scratch_shapes=[pltpu.VMEM((bt, H), jnp.float32),   # carried z
                            pltpu.VMEM((bt, I), jnp.float32)],  # x halo row
        ),
        compiler_params=pltpu.CompilerParams(
            dimension_semantics=("parallel", "arbitrary"),
            vmem_limit_bytes=vmem_limit),
    )(x_t, *weights)

    return jnp.transpose(out_tbh, (1, 0, 2))             # (B, T, H)


# ------------------------- pure-JAX reference (for checking) ------------------
def reference_forward(x, p):
    B, T, I = x.shape
    H = p["W_in"].shape[0]
    z = x[:, 0, :] @ p["W_in"].T + p["b_in"]
    outs = [z]
    for step in range(T - 1):
        t = step / (T - 1)
        h = jnp.concatenate([z, jnp.full((B, 1), t, jnp.float32)], axis=-1)
        h = jnp.maximum(h @ p["W1"].T + p["b1"], 0.0)
        h = jnp.maximum(h @ p["W2"].T + p["b2"], 0.0)
        F = jnp.tanh(h @ p["W3"].T + p["b3"]).reshape(B, H, I)
        dX = x[:, step + 1, :] - x[:, step, :]
        z = z + jnp.einsum("bhi,bi->bh", F, dX)
        outs.append(z)
    return jnp.stack(outs, axis=1)


def init_params(key, input_size, hidden_size):
    """Deterministic init mimicking nn.Linear default (uniform +-1/sqrt(fan_in))."""
    H, I = hidden_size, input_size
    ks = jax.random.split(key, 8)

    def lin(k, fan_in, shape):
        bound = 1.0 / jnp.sqrt(jnp.float32(fan_in))
        return jax.random.uniform(k, shape, jnp.float32, -bound, bound)

    return {
        "W_in": lin(ks[0], I, (H, I)),         "b_in": lin(ks[1], I, (H,)),
        "W1":   lin(ks[2], H + 1, (H, H + 1)), "b1":   lin(ks[3], H + 1, (H,)),
        "W2":   lin(ks[4], H, (H, H)),         "b2":   lin(ks[5], H, (H,)),
        "W3":   lin(ks[6], H, (H * I, H)),     "b3":   lin(ks[7], H, (H * I,)),
    }


if __name__ == "__main__":
    # Small shapes, but chosen to exercise the (batch, time) grid: 2 x 4 blocks.
    B, T, I, H = 16, 16, 4, 32   # batch, seq-len, input channels, hidden size

    key = jax.random.PRNGKey(0)
    k_x, k_p = jax.random.split(key)
    x = jax.random.normal(k_x, (B, T, I), dtype=jnp.float32)
    params = init_params(k_p, I, H)

    out = neural_cde_forward(x, params, bt=8, tt=4)
    out = jax.block_until_ready(out)

    ref = reference_forward(x, params)
    assert out.shape == (B, T, H), out.shape
    max_err = float(jnp.max(jnp.abs(out - ref)))
    assert jnp.allclose(out, ref, atol=1e-3, rtol=1e-3), max_err

    print("KERNEL_OK")
</pallas_src>

<mosaic_0001>
module attributes {stable_mosaic.version = 11 : i64} {
  func.func @kernel(%arg0: i32, %arg1: i32, %arg2: memref<4x8x4xf32, #tpu.memory_space<vmem>>, %arg3: memref<4x32xf32, #tpu.memory_space<vmem>>, %arg4: memref<1x32xf32, #tpu.memory_space<vmem>>, %arg5: memref<32x32xf32, #tpu.memory_space<vmem>>, %arg6: memref<1x32xf32, #tpu.memory_space<vmem>>, %arg7: memref<1x32xf32, #tpu.memory_space<vmem>>, %arg8: memref<32x32xf32, #tpu.memory_space<vmem>>, %arg9: memref<1x32xf32, #tpu.memory_space<vmem>>, %arg10: memref<32x128xf32, #tpu.memory_space<vmem>>, %arg11: memref<1x128xf32, #tpu.memory_space<vmem>>, %arg12: memref<4x8x32xf32, #tpu.memory_space<vmem>>, %arg13: memref<8x32xf32, #tpu.memory_space<vmem>>, %arg14: memref<8x4xf32, #tpu.memory_space<vmem>>) attributes {dimension_semantics = [#tpu.dimension_semantics<parallel>, #tpu.dimension_semantics<arbitrary>], iteration_bounds = array<i64: 2, 4>, scalar_prefetch = 0 : i64, scratch_operands = 2 : i64, tpu.core_type = #tpu.core_type<tc>, window_params = [{transform_indices = @transform_0, window_bounds = array<i64: 4, 8, 4>}, {pipeline_mode = #tpu.pipeline_mode<synchronous>, transform_indices = @transform_1, window_bounds = array<i64: 4, 32>}, {pipeline_mode = #tpu.pipeline_mode<synchronous>, transform_indices = @transform_2, window_bounds = array<i64: 1, 32>}, {pipeline_mode = #tpu.pipeline_mode<synchronous>, transform_indices = @transform_3, window_bounds = array<i64: 32, 32>}, {pipeline_mode = #tpu.pipeline_mode<synchronous>, transform_indices = @transform_4, window_bounds = array<i64: 1, 32>}, {pipeline_mode = #tpu.pipeline_mode<synchronous>, transform_indices = @transform_5, window_bounds = array<i64: 1, 32>}, {pipeline_mode = #tpu.pipeline_mode<synchronous>, transform_indices = @transform_6, window_bounds = array<i64: 32, 32>}, {pipeline_mode = #tpu.pipeline_mode<synchronous>, transform_indices = @transform_7, window_bounds = array<i64: 1, 32>}, {pipeline_mode = #tpu.pipeline_mode<synchronous>, transform_indices = @transform_8, window_bounds = array<i64: 32, 128>}, {pipeline_mode = #tpu.pipeline_mode<synchronous>, transform_indices = @transform_9, window_bounds = array<i64: 1, 128>}, {transform_indices = @transform_10, window_bounds = array<i64: 4, 8, 32>}]} {
    %c4_i32 = arith.constant 4 : i32
    %0 = arith.muli %arg1, %c4_i32 : i32
    %c0 = arith.constant 0 : index
    %c0_0 = arith.constant 0 : index
    %1 = vector.load %arg3[%c0, %c0_0] : memref<4x32xf32, #tpu.memory_space<vmem>>, vector<4x32xf32>
    %c0_1 = arith.constant 0 : index
    %c0_2 = arith.constant 0 : index
    %2 = vector.load %arg4[%c0_1, %c0_2] : memref<1x32xf32, #tpu.memory_space<vmem>>, vector<1x32xf32>
    %c0_3 = arith.constant 0 : index
    %c0_4 = arith.constant 0 : index
    %3 = vector.load %arg5[%c0_3, %c0_4] : memref<32x32xf32, #tpu.memory_space<vmem>>, vector<32x32xf32>
    %c0_5 = arith.constant 0 : index
    %c0_6 = arith.constant 0 : index
    %4 = vector.load %arg6[%c0_5, %c0_6] : memref<1x32xf32, #tpu.memory_space<vmem>>, vector<1x32xf32>
    %c0_7 = arith.constant 0 : index
    %c0_8 = arith.constant 0 : index
    %5 = vector.load %arg7[%c0_7, %c0_8] : memref<1x32xf32, #tpu.memory_space<vmem>>, vector<1x32xf32>
    %c0_9 = arith.constant 0 : index
    %c0_10 = arith.constant 0 : index
    %6 = vector.load %arg8[%c0_9, %c0_10] : memref<32x32xf32, #tpu.memory_space<vmem>>, vector<32x32xf32>
    %c0_11 = arith.constant 0 : index
    %c0_12 = arith.constant 0 : index
    %7 = vector.load %arg9[%c0_11, %c0_12] : memref<1x32xf32, #tpu.memory_space<vmem>>, vector<1x32xf32>
    %c0_13 = arith.constant 0 : index
    %c0_14 = arith.constant 0 : index
    %8 = vector.load %arg10[%c0_13, %c0_14] : memref<32x128xf32, #tpu.memory_space<vmem>>, vector<32x128xf32>
    %c0_15 = arith.constant 0 : index
    %c0_16 = arith.constant 0 : index
    %9 = vector.load %arg11[%c0_15, %c0_16] : memref<1x128xf32, #tpu.memory_space<vmem>>, vector<1x128xf32>
    %c0_i32 = arith.constant 0 : i32
    %10 = arith.cmpi eq, %arg1, %c0_i32 : i32
    %11 = arith.extui %10 : i1 to i32
    %c0_i32_17 = arith.constant 0 : i32
    %12 = arith.cmpi ne, %11, %c0_i32_17 : i32
    scf.if %12 {
      %c0_70 = arith.constant 0 : index
      %c0_71 = arith.constant 0 : index
      %c0_72 = arith.constant 0 : index
      %180 = vector.load %arg2[%c0_70, %c0_71, %c0_72] : memref<4x8x4xf32, #tpu.memory_space<vmem>>, vector<1x8x4xf32>
      %181 = vector.shape_cast %180 : vector<1x8x4xf32> to vector<8x4xf32>
      %cst_73 = arith.constant dense<0.000000e+00> : vector<8x32xf32>
      %182 = tpu.matmul %181, %1, %cst_73 {dimension_numbers = #tpu.dot_dimension_numbers<[1], [0], [0], [1], [0, 0, 1, 1], [], []>} : vector<8x4xf32>, vector<4x32xf32>, vector<8x32xf32> -> vector<8x32xf32>
      %183 = vector.broadcast %2 : vector<1x32xf32> to vector<8x32xf32>
      %184 = arith.addf %182, %183 : vector<8x32xf32>
      %c0_74 = arith.constant 0 : index
      %c0_75 = arith.constant 0 : index
      %185 = vector.load %arg13[%c0_74, %c0_75] : memref<8x32xf32, #tpu.memory_space<vmem>>, vector<8x32xf32>
      tpu.vector_store %arg13[%c0_74, %c0_75], %184 {strides = array<i32>} : memref<8x32xf32, #tpu.memory_space<vmem>>, vector<8x32xf32>,
      %c0_76 = arith.constant 0 : index
      %c0_77 = arith.constant 0 : index
      %c0_78 = arith.constant 0 : index
      %186 = vector.load %arg12[%c0_76, %c0_77, %c0_78] : memref<4x8x32xf32, #tpu.memory_space<vmem>>, vector<1x8x32xf32>
      %187 = vector.shape_cast %186 : vector<1x8x32xf32> to vector<8x32xf32>
      %188 = vector.shape_cast %184 : vector<8x32xf32> to vector<1x8x32xf32>
      tpu.vector_store %arg12[%c0_76, %c0_77, %c0_78], %188 {strides = array<i32>} : memref<4x8x32xf32, #tpu.memory_space<vmem>>, vector<1x8x32xf32>,
    } else {
    }
    %c0_i32_18 = arith.constant 0 : i32
    %13 = arith.cmpi sgt, %arg1, %c0_i32_18 : i32
    %14 = arith.extui %13 : i1 to i32
    %c0_i32_19 = arith.constant 0 : i32
    %15 = arith.cmpi ne, %14, %c0_i32_19 : i32
    scf.if %15 {
      %c1_i32_70 = arith.constant 1 : i32
      %180 = arith.subi %0, %c1_i32_70 : i32
      %c0_71 = arith.constant 0 : index
      %c0_72 = arith.constant 0 : index
      %181 = vector.load %arg13[%c0_71, %c0_72] : memref<8x32xf32, #tpu.memory_space<vmem>>, vector<8x32xf32>
      %c0_73 = arith.constant 0 : index
      %c0_74 = arith.constant 0 : index
      %182 = vector.load %arg14[%c0_73, %c0_74] : memref<8x4xf32, #tpu.memory_space<vmem>>, vector<8x4xf32>
      %c0_75 = arith.constant 0 : index
      %c0_76 = arith.constant 0 : index
      %c0_77 = arith.constant 0 : index
      %183 = vector.load %arg2[%c0_75, %c0_76, %c0_77] : memref<4x8x4xf32, #tpu.memory_space<vmem>>, vector<1x8x4xf32>
      %184 = vector.shape_cast %183 : vector<1x8x4xf32> to vector<8x4xf32>
      %185 = arith.sitofp %180 : i32 to f32
      %cst_78 = arith.constant 0.0666666701 : f32
      %186 = arith.mulf %185, %cst_78 : f32
      %cst_79 = arith.constant dense<0.000000e+00> : vector<8x32xf32>
      %187 = tpu.matmul %181, %3, %cst_79 {dimension_numbers = #tpu.dot_dimension_numbers<[1], [0], [0], [1], [0, 0, 1, 1], [], []>} : vector<8x32xf32>, vector<32x32xf32>, vector<8x32xf32> -> vector<8x32xf32>
      %188 = vector.broadcast %186 : f32 to vector<1x32xf32>
      %189 = arith.mulf %188, %4 : vector<1x32xf32>
      %190 = arith.addf %5, %189 : vector<1x32xf32>
      %191 = vector.broadcast %190 : vector<1x32xf32> to vector<8x32xf32>
      %192 = arith.addf %187, %191 : vector<8x32xf32>
      %cst_80 = arith.constant 0.000000e+00 : f32
      %193 = vector.broadcast %cst_80 : f32 to vector<8x32xf32>
      %194 = arith.maximumf %192, %193 : vector<8x32xf32>
      %cst_81 = arith.constant dense<0.000000e+00> : vector<8x32xf32>
      %195 = tpu.matmul %194, %6, %cst_81 {dimension_numbers = #tpu.dot_dimension_numbers<[1], [0], [0], [1], [0, 0, 1, 1], [], []>} : vector<8x32xf32>, vector<32x32xf32>, vector<8x32xf32> -> vector<8x32xf32>
      %196 = vector.broadcast %7 : vector<1x32xf32> to vector<8x32xf32>
      %197 = arith.addf %195, %196 : vector<8x32xf32>
      %cst_82 = arith.constant 0.000000e+00 : f32
      %198 = vector.broadcast %cst_82 : f32 to vector<8x32xf32>
      %199 = arith.maximumf %197, %198 : vector<8x32xf32>
      %cst_83 = arith.constant dense<0.000000e+00> : vector<8x128xf32>
      %200 = tpu.matmul %199, %8, %cst_83 {dimension_numbers = #tpu.dot_dimension_numbers<[1], [0], [0], [1], [0, 0, 1, 1], [], []>} : vector<8x32xf32>, vector<32x128xf32>, vector<8x128xf32> -> vector<8x128xf32>
      %201 = vector.broadcast %9 : vector<1x128xf32> to vector<8x128xf32>
      %202 = arith.addf %200, %201 : vector<8x128xf32>
      %203 = math.tanh %202 : vector<8x128xf32>
      %204 = arith.subf %184, %182 : vector<8x4xf32>
      %205 = vector.extract_strided_slice %203 {offsets = [0, 0], sizes = [8, 32], strides = [1, 1]} : vector<8x128xf32> to vector<8x32xf32>
      %206 = vector.extract_strided_slice %204 {offsets = [0, 0], sizes = [8, 1], strides = [1, 1]} : vector<8x4xf32> to vector<8x1xf32>
      %207 = vector.broadcast %206 : vector<8x1xf32> to vector<8x32xf32>
      %208 = arith.mulf %205, %207 : vector<8x32xf32>
      %209 = arith.addf %181, %208 : vector<8x32xf32>
      %210 = vector.extract_strided_slice %203 {offsets = [0, 32], sizes = [8, 32], strides = [1, 1]} : vector<8x128xf32> to vector<8x32xf32>
      %211 = vector.extract_strided_slice %204 {offsets = [0, 1], sizes = [8, 1], strides = [1, 1]} : vector<8x4xf32> to vector<8x1xf32>
      %212 = vector.broadcast %211 : vector<8x1xf32> to vector<8x32xf32>
      %213 = arith.mulf %210, %212 : vector<8x32xf32>
      %214 = arith.addf %209, %213 : vector<8x32xf32>
      %215 = vector.extract_strided_slice %203 {offsets = [0, 64], sizes = [8, 32], strides = [1, 1]} : vector<8x128xf32> to vector<8x32xf32>
      %216 = vector.extract_strided_slice %204 {offsets = [0, 2], sizes = [8, 1], strides = [1, 1]} : vector<8x4xf32> to vector<8x1xf32>
      %217 = vector.broadcast %216 : vector<8x1xf32> to vector<8x32xf32>
      %218 = arith.mulf %215, %217 : vector<8x32xf32>
      %219 = arith.addf %214, %218 : vector<8x32xf32>
      %220 = vector.extract_strided_slice %203 {offsets = [0, 96], sizes = [8, 32], strides = [1, 1]} : vector<8x128xf32> to vector<8x32xf32>
      %221 = vector.extract_strided_slice %204 {offsets = [0, 3], sizes = [8, 1], strides = [1, 1]} : vector<8x4xf32> to vector<8x1xf32>
      %222 = vector.broadcast %221 : vector<8x1xf32> to vector<8x32xf32>
      %223 = arith.mulf %220, %222 : vector<8x32xf32>
      %224 = arith.addf %219, %223 : vector<8x32xf32>
      %c0_84 = arith.constant 0 : index
      %c0_85 = arith.constant 0 : index
      %225 = vector.load %arg13[%c0_84, %c0_85] : memref<8x32xf32, #tpu.memory_space<vmem>>, vector<8x32xf32>
      tpu.vector_store %arg13[%c0_84, %c0_85], %224 {strides = array<i32>} : memref<8x32xf32, #tpu.memory_space<vmem>>, vector<8x32xf32>,
      %c0_86 = arith.constant 0 : index
      %c0_87 = arith.constant 0 : index
      %c0_88 = arith.constant 0 : index
      %226 = vector.load %arg12[%c0_86, %c0_87, %c0_88] : memref<4x8x32xf32, #tpu.memory_space<vmem>>, vector<1x8x32xf32>
      %227 = vector.shape_cast %226 : vector<1x8x32xf32> to vector<8x32xf32>
      %228 = vector.shape_cast %224 : vector<8x32xf32> to vector<1x8x32xf32>
      tpu.vector_store %arg12[%c0_86, %c0_87, %c0_88], %228 {strides = array<i32>} : memref<4x8x32xf32, #tpu.memory_space<vmem>>, vector<1x8x32xf32>,
    } else {
    }
    %c0_20 = arith.constant 0 : index
    %c0_21 = arith.constant 0 : index
    %16 = vector.load %arg13[%c0_20, %c0_21] : memref<8x32xf32, #tpu.memory_space<vmem>>, vector<8x32xf32>
    %c1_i32 = arith.constant 1 : i32
    %17 = arith.addi %0, %c1_i32 : i32
    %c1_i32_22 = arith.constant 1 : i32
    %18 = arith.subi %17, %c1_i32_22 : i32
    %c1_i32_23 = arith.constant 1 : i32
    %19 = arith.subi %c1_i32, %c1_i32_23 : i32
    %20 = arith.index_cast %19 : i32 to index
    %c0_24 = arith.constant 0 : index
    %c0_25 = arith.constant 0 : index
    %21 = vector.load %arg2[%20, %c0_24, %c0_25] : memref<4x8x4xf32, #tpu.memory_space<vmem>>, vector<1x8x4xf32>
    %22 = vector.shape_cast %21 : vector<1x8x4xf32> to vector<8x4xf32>
    %23 = arith.index_cast %c1_i32 : i32 to index
    %c0_26 = arith.constant 0 : index
    %c0_27 = arith.constant 0 : index
    %24 = vector.load %arg2[%23, %c0_26, %c0_27] : memref<4x8x4xf32, #tpu.memory_space<vmem>>, vector<1x8x4xf32>
    %25 = vector.shape_cast %24 : vector<1x8x4xf32> to vector<8x4xf32>
    %26 = arith.sitofp %18 : i32 to f32
    %cst = arith.constant 0.0666666701 : f32
    %27 = arith.mulf %26, %cst : f32
    %cst_28 = arith.constant dense<0.000000e+00> : vector<8x32xf32>
    %28 = tpu.matmul %16, %3, %cst_28 {dimension_numbers = #tpu.dot_dimension_numbers<[1], [0], [0], [1], [0, 0, 1, 1], [], []>} : vector<8x32xf32>, vector<32x32xf32>, vector<8x32xf32> -> vector<8x32xf32>
    %29 = vector.broadcast %27 : f32 to vector<1x32xf32>
    %30 = arith.mulf %29, %4 : vector<1x32xf32>
    %31 = arith.addf %5, %30 : vector<1x32xf32>
    %32 = vector.broadcast %31 : vector<1x32xf32> to vector<8x32xf32>
    %33 = arith.addf %28, %32 : vector<8x32xf32>
    %cst_29 = arith.constant 0.000000e+00 : f32
    %34 = vector.broadcast %cst_29 : f32 to vector<8x32xf32>
    %35 = arith.maximumf %33, %34 : vector<8x32xf32>
    %cst_30 = arith.constant dense<0.000000e+00> : vector<8x32xf32>
    %36 = tpu.matmul %35, %6, %cst_30 {dimension_numbers = #tpu.dot_dimension_numbers<[1], [0], [0], [1], [0, 0, 1, 1], [], []>} : vector<8x32xf32>, vector<32x32xf32>, vector<8x32xf32> -> vector<8x32xf32>
    %37 = vector.broadcast %7 : vector<1x32xf32> to vector<8x32xf32>
    %38 = arith.addf %36, %37 : vector<8x32xf32>
    %cst_31 = arith.constant 0.000000e+00 : f32
    %39 = vector.broadcast %cst_31 : f32 to vector<8x32xf32>
    %40 = arith.maximumf %38, %39 : vector<8x32xf32>
    %cst_32 = arith.constant dense<0.000000e+00> : vector<8x128xf32>
    %41 = tpu.matmul %40, %8, %cst_32 {dimension_numbers = #tpu.dot_dimension_numbers<[1], [0], [0], [1], [0, 0, 1, 1], [], []>} : vector<8x32xf32>, vector<32x128xf32>, vector<8x128xf32> -> vector<8x128xf32>
    %42 = vector.broadcast %9 : vector<1x128xf32> to vector<8x128xf32>
    %43 = arith.addf %41, %42 : vector<8x128xf32>
    %44 = math.tanh %43 : vector<8x128xf32>
    %45 = arith.subf %25, %22 : vector<8x4xf32>
    %46 = vector.extract_strided_slice %44 {offsets = [0, 0], sizes = [8, 32], strides = [1, 1]} : vector<8x128xf32> to vector<8x32xf32>
    %47 = vector.extract_strided_slice %45 {offsets = [0, 0], sizes = [8, 1], strides = [1, 1]} : vector<8x4xf32> to vector<8x1xf32>
    %48 = vector.broadcast %47 : vector<8x1xf32> to vector<8x32xf32>
    %49 = arith.mulf %46, %48 : vector<8x32xf32>
    %50 = arith.addf %16, %49 : vector<8x32xf32>
    %51 = vector.extract_strided_slice %44 {offsets = [0, 32], sizes = [8, 32], strides = [1, 1]} : vector<8x128xf32> to vector<8x32xf32>
    %52 = vector.extract_strided_slice %45 {offsets = [0, 1], sizes = [8, 1], strides = [1, 1]} : vector<8x4xf32> to vector<8x1xf32>
    %53 = vector.broadcast %52 : vector<8x1xf32> to vector<8x32xf32>
    %54 = arith.mulf %51, %53 : vector<8x32xf32>
    %55 = arith.addf %50, %54 : vector<8x32xf32>
    %56 = vector.extract_strided_slice %44 {offsets = [0, 64], sizes = [8, 32], strides = [1, 1]} : vector<8x128xf32> to vector<8x32xf32>
    %57 = vector.extract_strided_slice %45 {offsets = [0, 2], sizes = [8, 1], strides = [1, 1]} : vector<8x4xf32> to vector<8x1xf32>
    %58 = vector.broadcast %57 : vector<8x1xf32> to vector<8x32xf32>
    %59 = arith.mulf %56, %58 : vector<8x32xf32>
    %60 = arith.addf %55, %59 : vector<8x32xf32>
    %61 = vector.extract_strided_slice %44 {offsets = [0, 96], sizes = [8, 32], strides = [1, 1]} : vector<8x128xf32> to vector<8x32xf32>
    %62 = vector.extract_strided_slice %45 {offsets = [0, 3], sizes = [8, 1], strides = [1, 1]} : vector<8x4xf32> to vector<8x1xf32>
    %63 = vector.broadcast %62 : vector<8x1xf32> to vector<8x32xf32>
    %64 = arith.mulf %61, %63 : vector<8x32xf32>
    %65 = arith.addf %60, %64 : vector<8x32xf32>
    %66 = arith.index_cast %c1_i32 : i32 to index
    %c0_33 = arith.constant 0 : index
    %c0_34 = arith.constant 0 : index
    %67 = vector.load %arg12[%66, %c0_33, %c0_34] : memref<4x8x32xf32, #tpu.memory_space<vmem>>, vector<1x8x32xf32>
    %68 = vector.shape_cast %67 : vector<1x8x32xf32> to vector<8x32xf32>
    %69 = vector.shape_cast %65 : vector<8x32xf32> to vector<1x8x32xf32>
    tpu.vector_store %arg12[%66, %c0_33, %c0_34], %69 {strides = array<i32>} : memref<4x8x32xf32, #tpu.memory_space<vmem>>, vector<1x8x32xf32>,
    %c2_i32 = arith.constant 2 : i32
    %70 = arith.addi %0, %c2_i32 : i32
    %c1_i32_35 = arith.constant 1 : i32
    %71 = arith.subi %70, %c1_i32_35 : i32
    %c1_i32_36 = arith.constant 1 : i32
    %72 = arith.subi %c2_i32, %c1_i32_36 : i32
    %73 = arith.index_cast %72 : i32 to index
    %c0_37 = arith.constant 0 : index
    %c0_38 = arith.constant 0 : index
    %74 = vector.load %arg2[%73, %c0_37, %c0_38] : memref<4x8x4xf32, #tpu.memory_space<vmem>>, vector<1x8x4xf32>
    %75 = vector.shape_cast %74 : vector<1x8x4xf32> to vector<8x4xf32>
    %76 = arith.index_cast %c2_i32 : i32 to index
    %c0_39 = arith.constant 0 : index
    %c0_40 = arith.constant 0 : index
    %77 = vector.load %arg2[%76, %c0_39, %c0_40] : memref<4x8x4xf32, #tpu.memory_space<vmem>>, vector<1x8x4xf32>
    %78 = vector.shape_cast %77 : vector<1x8x4xf32> to vector<8x4xf32>
    %79 = arith.sitofp %71 : i32 to f32
    %cst_41 = arith.constant 0.0666666701 : f32
    %80 = arith.mulf %79, %cst_41 : f32
    %cst_42 = arith.constant dense<0.000000e+00> : vector<8x32xf32>
    %81 = tpu.matmul %65, %3, %cst_42 {dimension_numbers = #tpu.dot_dimension_numbers<[1], [0], [0], [1], [0, 0, 1, 1], [], []>} : vector<8x32xf32>, vector<32x32xf32>, vector<8x32xf32> -> vector<8x32xf32>
    %82 = vector.broadcast %80 : f32 to vector<1x32xf32>
    %83 = arith.mulf %82, %4 : vector<1x32xf32>
    %84 = arith.addf %5, %83 : vector<1x32xf32>
    %85 = vector.broadcast %84 : vector<1x32xf32> to vector<8x32xf32>
    %86 = arith.addf %81, %85 : vector<8x32xf32>
    %cst_43 = arith.constant 0.000000e+00 : f32
    %87 = vector.broadcast %cst_43 : f32 to vector<8x32xf32>
    %88 = arith.maximumf %86, %87 : vector<8x32xf32>
    %cst_44 = arith.constant dense<0.000000e+00> : vector<8x32xf32>
    %89 = tpu.matmul %88, %6, %cst_44 {dimension_numbers = #tpu.dot_dimension_numbers<[1], [0], [0], [1], [0, 0, 1, 1], [], []>} : vector<8x32xf32>, vector<32x32xf32>, vector<8x32xf32> -> vector<8x32xf32>
    %90 = vector.broadcast %7 : vector<1x32xf32> to vector<8x32xf32>
    %91 = arith.addf %89, %90 : vector<8x32xf32>
    %cst_45 = arith.constant 0.000000e+00 : f32
    %92 = vector.broadcast %cst_45 : f32 to vector<8x32xf32>
    %93 = arith.maximumf %91, %92 : vector<8x32xf32>
    %cst_46 = arith.constant dense<0.000000e+00> : vector<8x128xf32>
    %94 = tpu.matmul %93, %8, %cst_46 {dimension_numbers = #tpu.dot_dimension_numbers<[1], [0], [0], [1], [0, 0, 1, 1], [], []>} : vector<8x32xf32>, vector<32x128xf32>, vector<8x128xf32> -> vector<8x128xf32>
    %95 = vector.broadcast %9 : vector<1x128xf32> to vector<8x128xf32>
    %96 = arith.addf %94, %95 : vector<8x128xf32>
    %97 = math.tanh %96 : vector<8x128xf32>
    %98 = arith.subf %78, %75 : vector<8x4xf32>
    %99 = vector.extract_strided_slice %97 {offsets = [0, 0], sizes = [8, 32], strides = [1, 1]} : vector<8x128xf32> to vector<8x32xf32>
    %100 = vector.extract_strided_slice %98 {offsets = [0, 0], sizes = [8, 1], strides = [1, 1]} : vector<8x4xf32> to vector<8x1xf32>
    %101 = vector.broadcast %100 : vector<8x1xf32> to vector<8x32xf32>
    %102 = arith.mulf %99, %101 : vector<8x32xf32>
    %103 = arith.addf %65, %102 : vector<8x32xf32>
    %104 = vector.extract_strided_slice %97 {offsets = [0, 32], sizes = [8, 32], strides = [1, 1]} : vector<8x128xf32> to vector<8x32xf32>
    %105 = vector.extract_strided_slice %98 {offsets = [0, 1], sizes = [8, 1], strides = [1, 1]} : vector<8x4xf32> to vector<8x1xf32>
    %106 = vector.broadcast %105 : vector<8x1xf32> to vector<8x32xf32>
    %107 = arith.mulf %104, %106 : vector<8x32xf32>
    %108 = arith.addf %103, %107 : vector<8x32xf32>
    %109 = vector.extract_strided_slice %97 {offsets = [0, 64], sizes = [8, 32], strides = [1, 1]} : vector<8x128xf32> to vector<8x32xf32>
    %110 = vector.extract_strided_slice %98 {offsets = [0, 2], sizes = [8, 1], strides = [1, 1]} : vector<8x4xf32> to vector<8x1xf32>
    %111 = vector.broadcast %110 : vector<8x1xf32> to vector<8x32xf32>
    %112 = arith.mulf %109, %111 : vector<8x32xf32>
    %113 = arith.addf %108, %112 : vector<8x32xf32>
    %114 = vector.extract_strided_slice %97 {offsets = [0, 96], sizes = [8, 32], strides = [1, 1]} : vector<8x128xf32> to vector<8x32xf32>
    %115 = vector.extract_strided_slice %98 {offsets = [0, 3], sizes = [8, 1], strides = [1, 1]} : vector<8x4xf32> to vector<8x1xf32>
    %116 = vector.broadcast %115 : vector<8x1xf32> to vector<8x32xf32>
    %117 = arith.mulf %114, %116 : vector<8x32xf32>
    %118 = arith.addf %113, %117 : vector<8x32xf32>
    %119 = arith.index_cast %c2_i32 : i32 to index
    %c0_47 = arith.constant 0 : index
    %c0_48 = arith.constant 0 : index
    %120 = vector.load %arg12[%119, %c0_47, %c0_48] : memref<4x8x32xf32, #tpu.memory_space<vmem>>, vector<1x8x32xf32>
    %121 = vector.shape_cast %120 : vector<1x8x32xf32> to vector<8x32xf32>
    %122 = vector.shape_cast %118 : vector<8x32xf32> to vector<1x8x32xf32>
    tpu.vector_store %arg12[%119, %c0_47, %c0_48], %122 {strides = array<i32>} : memref<4x8x32xf32, #tpu.memory_space<vmem>>, vector<1x8x32xf32>,
    %c3_i32 = arith.constant 3 : i32
    %123 = arith.addi %0, %c3_i32 : i32
    %c1_i32_49 = arith.constant 1 : i32
    %124 = arith.subi %123, %c1_i32_49 : i32
    %c1_i32_50 = arith.constant 1 : i32
    %125 = arith.subi %c3_i32, %c1_i32_50 : i32
    %126 = arith.index_cast %125 : i32 to index
    %c0_51 = arith.constant 0 : index
    %c0_52 = arith.constant 0 : index
    %127 = vector.load %arg2[%126, %c0_51, %c0_52] : memref<4x8x4xf32, #tpu.memory_space<vmem>>, vector<1x8x4xf32>
    %128 = vector.shape_cast %127 : vector<1x8x4xf32> to vector<8x4xf32>
    %129 = arith.index_cast %c3_i32 : i32 to index
    %c0_53 = arith.constant 0 : index
    %c0_54 = arith.constant 0 : index
    %130 = vector.load %arg2[%129, %c0_53, %c0_54] : memref<4x8x4xf32, #tpu.memory_space<vmem>>, vector<1x8x4xf32>
    %131 = vector.shape_cast %130 : vector<1x8x4xf32> to vector<8x4xf32>
    %132 = arith.sitofp %124 : i32 to f32
    %cst_55 = arith.constant 0.0666666701 : f32
    %133 = arith.mulf %132, %cst_55 : f32
    %cst_56 = arith.constant dense<0.000000e+00> : vector<8x32xf32>
    %134 = tpu.matmul %118, %3, %cst_56 {dimension_numbers = #tpu.dot_dimension_numbers<[1], [0], [0], [1], [0, 0, 1, 1], [], []>} : vector<8x32xf32>, vector<32x32xf32>, vector<8x32xf32> -> vector<8x32xf32>
    %135 = vector.broadcast %133 : f32 to vector<1x32xf32>
    %136 = arith.mulf %135, %4 : vector<1x32xf32>
    %137 = arith.addf %5, %136 : vector<1x32xf32>
    %138 = vector.broadcast %137 : vector<1x32xf32> to vector<8x32xf32>
    %139 = arith.addf %134, %138 : vector<8x32xf32>
    %cst_57 = arith.constant 0.000000e+00 : f32
    %140 = vector.broadcast %cst_57 : f32 to vector<8x32xf32>
    %141 = arith.maximumf %139, %140 : vector<8x32xf32>
    %cst_58 = arith.constant dense<0.000000e+00> : vector<8x32xf32>
    %142 = tpu.matmul %141, %6, %cst_58 {dimension_numbers = #tpu.dot_dimension_numbers<[1], [0], [0], [1], [0, 0, 1, 1], [], []>} : vector<8x32xf32>, vector<32x32xf32>, vector<8x32xf32> -> vector<8x32xf32>
    %143 = vector.broadcast %7 : vector<1x32xf32> to vector<8x32xf32>
    %144 = arith.addf %142, %143 : vector<8x32xf32>
    %cst_59 = arith.constant 0.000000e+00 : f32
    %145 = vector.broadcast %cst_59 : f32 to vector<8x32xf32>
    %146 = arith.maximumf %144, %145 : vector<8x32xf32>
    %cst_60 = arith.constant dense<0.000000e+00> : vector<8x128xf32>
    %147 = tpu.matmul %146, %8, %cst_60 {dimension_numbers = #tpu.dot_dimension_numbers<[1], [0], [0], [1], [0, 0, 1, 1], [], []>} : vector<8x32xf32>, vector<32x128xf32>, vector<8x128xf32> -> vector<8x128xf32>
    %148 = vector.broadcast %9 : vector<1x128xf32> to vector<8x128xf32>
    %149 = arith.addf %147, %148 : vector<8x128xf32>
    %150 = math.tanh %149 : vector<8x128xf32>
    %151 = arith.subf %131, %128 : vector<8x4xf32>
    %152 = vector.extract_strided_slice %150 {offsets = [0, 0], sizes = [8, 32], strides = [1, 1]} : vector<8x128xf32> to vector<8x32xf32>
    %153 = vector.extract_strided_slice %151 {offsets = [0, 0], sizes = [8, 1], strides = [1, 1]} : vector<8x4xf32> to vector<8x1xf32>
    %154 = vector.broadcast %153 : vector<8x1xf32> to vector<8x32xf32>
    %155 = arith.mulf %152, %154 : vector<8x32xf32>
    %156 = arith.addf %118, %155 : vector<8x32xf32>
    %157 = vector.extract_strided_slice %150 {offsets = [0, 32], sizes = [8, 32], strides = [1, 1]} : vector<8x128xf32> to vector<8x32xf32>
    %158 = vector.extract_strided_slice %151 {offsets = [0, 1], sizes = [8, 1], strides = [1, 1]} : vector<8x4xf32> to vector<8x1xf32>
    %159 = vector.broadcast %158 : vector<8x1xf32> to vector<8x32xf32>
    %160 = arith.mulf %157, %159 : vector<8x32xf32>
    %161 = arith.addf %156, %160 : vector<8x32xf32>
    %162 = vector.extract_strided_slice %150 {offsets = [0, 64], sizes = [8, 32], strides = [1, 1]} : vector<8x128xf32> to vector<8x32xf32>
    %163 = vector.extract_strided_slice %151 {offsets = [0, 2], sizes = [8, 1], strides = [1, 1]} : vector<8x4xf32> to vector<8x1xf32>
    %164 = vector.broadcast %163 : vector<8x1xf32> to vector<8x32xf32>
    %165 = arith.mulf %162, %164 : vector<8x32xf32>
    %166 = arith.addf %161, %165 : vector<8x32xf32>
    %167 = vector.extract_strided_slice %150 {offsets = [0, 96], sizes = [8, 32], strides = [1, 1]} : vector<8x128xf32> to vector<8x32xf32>
    %168 = vector.extract_strided_slice %151 {offsets = [0, 3], sizes = [8, 1], strides = [1, 1]} : vector<8x4xf32> to vector<8x1xf32>
    %169 = vector.broadcast %168 : vector<8x1xf32> to vector<8x32xf32>
    %170 = arith.mulf %167, %169 : vector<8x32xf32>
    %171 = arith.addf %166, %170 : vector<8x32xf32>
    %172 = arith.index_cast %c3_i32 : i32 to index
    %c0_61 = arith.constant 0 : index
    %c0_62 = arith.constant 0 : index
    %173 = vector.load %arg12[%172, %c0_61, %c0_62] : memref<4x8x32xf32, #tpu.memory_space<vmem>>, vector<1x8x32xf32>
    %174 = vector.shape_cast %173 : vector<1x8x32xf32> to vector<8x32xf32>
    %175 = vector.shape_cast %171 : vector<8x32xf32> to vector<1x8x32xf32>
    tpu.vector_store %arg12[%172, %c0_61, %c0_62], %175 {strides = array<i32>} : memref<4x8x32xf32, #tpu.memory_space<vmem>>, vector<1x8x32xf32>,
    %c3_i32_63 = arith.constant 3 : i32
    %c0_64 = arith.constant 0 : index
    %c0_65 = arith.constant 0 : index
    %176 = vector.load %arg13[%c0_64, %c0_65] : memref<8x32xf32, #tpu.memory_space<vmem>>, vector<8x32xf32>
    tpu.vector_store %arg13[%c0_64, %c0_65], %171 {strides = array<i32>} : memref<8x32xf32, #tpu.memory_space<vmem>>, vector<8x32xf32>,
    %c3 = arith.constant 3 : index
    %c0_66 = arith.constant 0 : index
    %c0_67 = arith.constant 0 : index
    %177 = vector.load %arg2[%c3, %c0_66, %c0_67] : memref<4x8x4xf32, #tpu.memory_space<vmem>>, vector<1x8x4xf32>
    %178 = vector.shape_cast %177 : vector<1x8x4xf32> to vector<8x4xf32>
    %c0_68 = arith.constant 0 : index
    %c0_69 = arith.constant 0 : index
    %179 = vector.load %arg14[%c0_68, %c0_69] : memref<8x4xf32, #tpu.memory_space<vmem>>, vector<8x4xf32>
    tpu.vector_store %arg14[%c0_68, %c0_69], %178 {strides = array<i32>} : memref<8x4xf32, #tpu.memory_space<vmem>>, vector<8x4xf32>,
    return
  }
  func.func @transform_0(%arg0: i32, %arg1: i32) -> (i32, i32, i32) {
    %c0_i32 = arith.constant 0 : i32
    %c0_i32_0 = arith.constant 0 : i32
    return %arg1, %arg0, %c0_i32 : i32, i32, i32
  }
  func.func @transform_1(%arg0: i32, %arg1: i32) -> (i32, i32) {
    %c0_i32 = arith.constant 0 : i32
    %c0_i32_0 = arith.constant 0 : i32
    %c0_i32_1 = arith.constant 0 : i32
    return %c0_i32, %c0_i32_0 : i32, i32
  }
  func.func @transform_2(%arg0: i32, %arg1: i32) -> (i32, i32) {
    %c0_i32 = arith.constant 0 : i32
    %c0_i32_0 = arith.constant 0 : i32
    %c0_i32_1 = arith.constant 0 : i32
    return %c0_i32, %c0_i32_0 : i32, i32
  }
  func.func @transform_3(%arg0: i32, %arg1: i32) -> (i32, i32) {
    %c0_i32 = arith.constant 0 : i32
    %c0_i32_0 = arith.constant 0 : i32
    %c0_i32_1 = arith.constant 0 : i32
    return %c0_i32, %c0_i32_0 : i32, i32
  }
  func.func @transform_4(%arg0: i32, %arg1: i32) -> (i32, i32) {
    %c0_i32 = arith.constant 0 : i32
    %c0_i32_0 = arith.constant 0 : i32
    %c0_i32_1 = arith.constant 0 : i32
    return %c0_i32, %c0_i32_0 : i32, i32
  }
  func.func @transform_5(%arg0: i32, %arg1: i32) -> (i32, i32) {
    %c0_i32 = arith.constant 0 : i32
    %c0_i32_0 = arith.constant 0 : i32
    %c0_i32_1 = arith.constant 0 : i32
    return %c0_i32, %c0_i32_0 : i32, i32
  }
  func.func @transform_6(%arg0: i32, %arg1: i32) -> (i32, i32) {
    %c0_i32 = arith.constant 0 : i32
    %c0_i32_0 = arith.constant 0 : i32
    %c0_i32_1 = arith.constant 0 : i32
    return %c0_i32, %c0_i32_0 : i32, i32
  }
  func.func @transform_7(%arg0: i32, %arg1: i32) -> (i32, i32) {
    %c0_i32 = arith.constant 0 : i32
    %c0_i32_0 = arith.constant 0 : i32
    %c0_i32_1 = arith.constant 0 : i32
    return %c0_i32, %c0_i32_0 : i32, i32
  }
  func.func @transform_8(%arg0: i32, %arg1: i32) -> (i32, i32) {
    %c0_i32 = arith.constant 0 : i32
    %c0_i32_0 = arith.constant 0 : i32
    %c0_i32_1 = arith.constant 0 : i32
    return %c0_i32, %c0_i32_0 : i32, i32
  }
  func.func @transform_9(%arg0: i32, %arg1: i32) -> (i32, i32) {
    %c0_i32 = arith.constant 0 : i32
    %c0_i32_0 = arith.constant 0 : i32
    %c0_i32_1 = arith.constant 0 : i32
    return %c0_i32, %c0_i32_0 : i32, i32
  }
  func.func @transform_10(%arg0: i32, %arg1: i32) -> (i32, i32, i32) {
    %c0_i32 = arith.constant 0 : i32
    %c0_i32_0 = arith.constant 0 : i32
    return %arg1, %arg0, %c0_i32 : i32, i32, i32
  }
}

</mosaic_0001>

<bundles_post_ra>
// kernel: tpu_custom_call.1
= control target key start
LH: loop header
LB: loop body
LE: loop exit
PB: predicated region body
PF: predicated region fallthrough
CT: control target
= control target key end

     0   :  { %s2827_s0 = inlined_call_operand.vmem [shape: f32[16,16,4], index: 0, kind: input, shape index: {}]   ;;  %s2828_s1 = inlined_call_operand.vmem [shape: f32[4,32], index: 1, kind: input, shape index: {}]   ;;  %s2829_s2 = inlined_call_operand.vmem [shape: f32[1,32], index: 2, kind: input, shape index: {}]   ;;  %s2830_s3 = inlined_call_operand.vmem [shape: f32[32,32], index: 3, kind: input, shape index: {}]   ;;  %s2831_s4 = inlined_call_operand.vmem [shape: f32[1,32], index: 4, kind: input, shape index: {}]   ;;  %s2832_s5 = inlined_call_operand.vmem [shape: f32[1,32], index: 5, kind: input, shape index: {}]   ;;  %s2833_s6 = inlined_call_operand.vmem [shape: f32[32,32], index: 6, kind: input, shape index: {}]   ;;  %s2834_s7 = inlined_call_operand.vmem [shape: f32[1,32], index: 7, kind: input, shape index: {}]   ;;  %s2835_s8 = inlined_call_operand.vmem [shape: f32[32,128], index: 8, kind: input, shape index: {}]   ;;  %s2836_s9 = inlined_call_operand.vmem [shape: f32[1,128], index: 9, kind: input, shape index: {}]   ;;  %s2837_s10 = inlined_call_operand.hbm [shape: f32[16,16,32], index: 10, kind: output, shape index: {}]  }
   0x1   :  { %2843 = sst [smem:[#allocation13_spill]] %s2827_s0 }
   0x2   :  { %15 = vsyncpa [#allocation6], 0 }
   0x3   :  { %17 = vsyncpa [#allocation6 + $0x1], 0  ;;  %s2394_s13 = smov 0   ;;  %s2396_s14 = smov 0  }
   0x4   :  { %s2398_s15 = smov 0   ;;  %s2400_s16 = smov 0  }
   0x5   :  { %s2402_s17 = smov 0   ;;  %s2404_s18 = smov 0  }
   0x6   :  { %s2406_s19 = smov 0   ;;  %s2408_s20 = smov 0  }
   0x7 LB: > { %2844 = sst [smem:[#allocation8_spill]] %s2283_s13  ;;  %s1777_s21 = sadd.s32 4294967295, %s2311_s20   ;;  %s2311_s20 = sphi %s2408_s20, %s23_s20   ;;  %s2307_s19 = sphi %s2406_s19, %s2857_s19   ;;  %s2303_s18 = sphi %s2404_s18, %s2862_s18   ;;  %s2299_s17 = sphi %s2402_s17, %s2855_s17   ;;  %s2295_s16 = sphi %s2400_s16, %s2861_s16   ;;  %s2291_s15 = sphi %s2398_s15, %s2860_s15   ;;  %s2287_s14 = sphi %s2396_s14, %s2859_s14   ;;  %s2283_s13 = sphi %s2394_s13, %s2858_s13  }
   0x8   : > { %2845 = sst [smem:[#allocation9_spill]] %s2307_s19  ;;  %s1778_s22 = sadd.s32 4294967294, %s2311_s20  }
   0x9   : > { %s32_s23 = sadd.s32 1, %s2303_s18  ;;  %s35_s24 = sadd.s32 1, %s2307_s19 }
   0xa   : > { %p33_p0 = scmp.ge.s32.totalorder %s32_s23, 4  ;;  %p51_p1 = scmp.ne.s32.totalorder %s2291_s15, %s2287_s14 }
   0xb   : > { %p52_p2 = scmp.eq.s32.totalorder %s2311_s20, 0  ;;  %p272_p5 = scmp.eq.s32.totalorder %s1777_s21, 7 }
   0xc   : > { %s2864_s23 = smov (%p33_p0, %s32_s23), 0  ;;  %s2866_s24 = smov (!%p33_p0, %s35_s24), %s2307_s19 }
   0xd   : > { %2846 = sst [smem:[#allocation10_spill]] %s2864_s23  ;;  %s39_s25 = ssub.s32 %s2303_s18, %s2864_s23 }
   0xe   : > { %p2446_p3 = por %p52_p2, %p51_p1  ;;  %p37_p4 = scmp.ge.s32.totalorder %s2866_s24, 2 }
   0xf   : > { %p277_p6 = scmp.ne.s32.totalorder %s2287_s14, %s2283_s13  ;;  %p278_p7 = scmp.eq.s32.totalorder %s1778_s22, 7 }
  0x10   : > { %s2868_s24 = smov (%p37_p4, %s2866_s24), 0  ;;  %p2454_p8 = por %p272_p5, %p51_p1 }
  0x11   : > { %2848 = sst [smem:[#allocation11_spill]] %s2868_s24  ;;  %p2458_p9 = por %p278_p7, %p277_p6 }
  0x12   : > { %s40_s29 = ssub.s32 %s2307_s19, %s2868_s24  ;;  %s44_s11 = sadd.s32 1, %s2291_s15 }
  0x13   : > { %s2850_s28 = scalar_select %p2458_p9, 1, 0 }
  0x14   : > { %s41_s30 = sor.u32 %s40_s29, %s39_s25  ;;  %p1780_p11 = scmp.ge.s32.totalorder %s2311_s20, 8 }
  0x15   : > { %2851 = sst [smem:[#allocation12_spill]] %s2850_s28  ;;  %p42_p10 = scmp.eq.s32.totalorder %s41_s30, 0 }
  0x16   : > { %321 = sbr.rel (%p1780_p11) target bundleno = 41 (0x29), region = 52 }
  0x17   : > { %s2466_s12 = scalar_select %p42_p10, %s2291_s15, %s44_s11  }
  0x1d   : > { %324 = sbr.rel (!%p2446_p3) target bundleno = 41 (0x29), region = 56  ;;  %s326_s21 = sand.u32 (%p2446_p3), 1, %s2291_s15  }
  0x1e   : > { %s1822_s22 = sshll.u32 (%p2446_p3), %s2303_s18, 3  ;;  %s1781_s23 = sshll.u32 (%p2446_p3), %s326_s21, 5 }
  0x1f   : > { %s331_s13 = sadd.s32 (%p2446_p3), %s2307_s19, %s1822_s22  ;;  %s2852_s0 = sld [smem:[#allocation13_spill]] (%p2446_p3) }
  0x20   : > { %s1784_s28 = sshll.u32 (%p2446_p3), %s331_s13, 3  ;;  %s328_s30 = scalar_lea.vmem (%p2446_p3), [#allocation4], %s1781_s23 }
  0x25   : > { %s333_s29 = scalar_lea.vmem %s2852_s0, %s1784_s28 }
  0x26   : > { %v367_v0 = vld [vmem:[%s333_s29] sm:$0xff]  ;;  %v369_v1 = vld [vmem:[%s333_s29 + $0x10] sm:$0xff] }
  0x27   : > { %v371_v2 = vld [vmem:[%s333_s29 + $0x20] sm:$0xff]  ;;  %368 = vst [vmem:[%s328_s30] sm:$0xff] %v367_v0  ;;  %370 = vst [vmem:[%s328_s30 + $0x8] sm:$0xff] %v369_v1  ;;  %v373_v3 = vld [vmem:[%s333_s29 + $0x30] sm:$0xff] }
  0x28   : > { %372 = vst [vmem:[%s328_s30 + $0x10] sm:$0xff] %v371_v2  ;;  %374 = vst [vmem:[%s328_s30 + $0x18] sm:$0xff] %v373_v3 }
  0x29 PF: > { %p1785_p12 = scmp.ge.s32.totalorder %s2311_s20, 1  ;;  %p379_p13 = scmp.lt.s32.totalorder %s2311_s20, 9 }
  0x2b   : > { %p380_p0 = pnand %p1785_p12, %p379_p13 }
  0x2c   : > { %s386_s13 = sand.u32 (!%p380_p0), 1, %s2287_s14   ;;  %s2481_s24 = sshll.u32 (!%p380_p0), %s2295_s16, 2  ;;  %v426_v4 = vld [vmem:[%s2828_s1] sm:$0xf] (!%p380_p0)  ;;  %v2499_v7 = vld [vmem:[%s2830_s3 + $0x8] sm:$0xff] (!%p380_p0)  ;;  %v2504_v8 = vld [vmem:[%s2830_s3 + $0x10] sm:$0xff] (!%p380_p0) }
  0x2d   : > { %383 = sbr.rel (%p380_p0) target bundleno = 3429 (0xd65), region = 94  ;;  %v1790_v5 = vld [vmem:[%s2829_s2] ss:$0 sm:$0xff] (!%p380_p0)  ;;  %s1786_s21 = sshll.u32 (!%p380_p0), %s386_s13, 5  ;;  %v2509_v9 = vld [vmem:[%s2830_s3 + $0x18] sm:$0xff] (!%p380_p0)  ;;  %v2529_v13 = vld [vmem:[%s2833_s6 + $0x8] sm:$0xff] (!%p380_p0) }
  0x2e   : > { %v2494_v6 = vld [vmem:[%s2830_s3] sm:$0xff] (!%p380_p0)  ;;  %v2534_v14 = vld [vmem:[%s2833_s6 + $0x10] sm:$0xff] (!%p380_p0)  ;;  %v2539_v15 = vld [vmem:[%s2833_s6 + $0x18] sm:$0xff] (!%p380_p0)  ;;  %s2571_s29 = scalar_lea.vmem (!%p380_p0), [#allocation4], %s1786_s21  ;;  %s2573_s30 = scalar_lea.vmem (!%p380_p0), [#allocation5], %s1786_s21 }
  0x2f   : > { %v2514_v10 = vld [vmem:[%s2831_s4] sm:$0x1] (!%p380_p0)  ;;  %v2554_v18 = vld [vmem:[%s2835_s8 + $0x8] sm:$0xff] (!%p380_p0)  ;;  %v2559_v19 = vld [vmem:[%s2835_s8 + $0x10] sm:$0xff] (!%p380_p0)  ;;  %p1789_p1 = scmp.ne.s32.totalorder (!%p380_p0), %s2295_s16, 0 }
  0x30   : > { %v2519_v11 = vld [vmem:[%s2833_s6] sm:$0xff] (!%p380_p0)  ;;  %v2564_v20 = vld [vmem:[%s2835_s8 + $0x18] sm:$0xff] (!%p380_p0) }
  0x31   : > { %v2524_v12 = vld [vmem:[%s2832_s5] sm:$0x1] (!%p380_p0) }
  0x32   : > { %v2544_v16 = vld [vmem:[%s2834_s7] sm:$0x1] (!%p380_p0) }
  0x33   : > { %v2549_v17 = vld [vmem:[%s2835_s8] sm:$0xff] (!%p380_p0) }
  0x34   : > { %v2569_v21 = vld [vmem:[%s2836_s9] sm:$0x1]  ;;  %447 = sbr.rel (%p1789_p1) target bundleno = 271 (0x10f), region = 102  ;;  %vm459_vm0 = vcmask (!%p1789_p1), 1043456   ;;  %v448_v22 = vld [vmem:[%s2571_s29] sm:$0xff] (!%p1789_p1)  ;;  %vm455_vm1 = vcmask (!%p1789_p1), 31744  }
  0x35   : > { %v2313_v23 = vmov (!%p1789_p1), 0.0   ;;  %vm2314_vm2 = vmmov (!%p1789_p1), 0   ;;  %vm533_vm3 = vcmask (!%p1789_p1), 261120  }
  0x36   : > { %1886 = vmatprep.subr.mxu0 (!%p1789_p1), %v2313_v23  ;;  %1888 = vmatprep.mubr.msk.f32.mxu0 (!%p1789_p1), %vm2314_vm2, %v2313_v23 }
  0x37   : > { %1887 = vmatpush3.msk.msra.mxu0 (!%p1789_p1), %vm459_vm0, %v426_v4 }
  0x38   : > { %1889 = vmatmul.mubr.msk.f32.vlgmr.msra.gmra.mrb[0].mxu0 (!%p1789_p1), %vm455_vm1, %v448_v22 }
 0x10b   : > { %v529_v24 = vpop.f32.mrb[0].mxu0 }
 0x10c   : > { %v530_v25 = vadd.f32 %v1790_v5, %v529_v24  ;;  %v1890_v26 = vpop.f32.mrb[1].mxu0 }
 0x10e   : > { %534 = vst.msk [vmem:[#allocation2] sm:$0xff] %vm533_vm3, %v530_v25  ;;  %535 = vst.msk [vmem:[%s2573_s30] sm:$0xff] %vm533_vm3, %v530_v25 }
 0x10f PF: > { %p1793_p2 = scmp.le.s32.totalorder %s2295_s16, 0 }
 0x110   : > { %v2024_v27 = vpack.c.bf16 (!%p1793_p2), %v2499_v7, %v2494_v6  ;;  %v2315_v28 = vmov (!%p1793_p2), 0.0|0.0   ;;  %v2030_v29 = vpack.c.bf16 (!%p1793_p2), %v2529_v13, %v2519_v11  ;;  %v2027_v30 = vpack.c.bf16 (!%p1793_p2), %v2509_v9, %v2504_v8  ;;  %s1794_s21 = sadd.s32 (!%p1793_p2), 4294967295, %s2481_s24  ;;  %v542_v47 = vld [vmem:[#allocation3] sm:$0xff] (!%p1793_p2)  ;;  %v543_v48 = vld [vmem:[%s2571_s29] sm:$0xff] (!%p1793_p2)  ;;  %s2322_s23 = smov (!%p1793_p2), 64  }
 0x111   : > { %539 = sbr.rel (%p1793_p2) target bundleno = 1062 (0x426), region = 106  ;;  %2023 = vmatprep.subr.bf16.mxu0 (!%p1793_p2), %v2315_v28  ;;  %2029 = vmatprep.subr.bf16.mxu1 (!%p1793_p2), %v2315_v28  ;;  %vm2316_vm4 = vmmov (!%p1793_p2), 0   ;;  %v2317_v31 = vmov (!%p1793_p2), 0.0   ;;  %vm555_vm5 = vcmask (!%p1793_p2), 261120   ;;  %v2033_v33 = vpack.c.bf16 (!%p1793_p2), %v2539_v15, %v2534_v14  ;;  %s544_s0 = scvt.s32.f32 (!%p1793_p2), %s1794_s21 }
 0x112   : > { %2025 = vmatpush3.bf16.msra.mxu0 (!%p1793_p2), %v2024_v27  ;;  %1899 = vmatprep.mubr.msk.f32.mxu0 (!%p1793_p2), %vm2316_vm4, %v2317_v31  ;;  %v2036_v34 = vpack.c.bf16 (!%p1793_p2), %v2554_v18, %v2549_v17  ;;  %v550_v35 = vlaneseq (!%p1793_p2)  ;;  %v2039_v46 = vpack.c.bf16 (!%p1793_p2), %v2564_v20, %v2559_v19  ;;  %v2318_v49 = vmov (!%p1793_p2), 3   ;;  %s2323_s26 = smov (!%p1793_p2), 96   ;;  %s2324_s28 = smov (!%p1793_p2), 32  }
 0x113   : > { %2026 = vmatprep.subr.bf16.mxu0 (!%p1793_p2), %v2315_v28  ;;  %2031 = vmatpush3.bf16.msra.mxu1 (!%p1793_p2), %v2030_v29  ;;  %s545_s19 = smul.f32 (!%p1793_p2), 0.06666667, %s544_s0  ;;  %v2319_v50 = vmov (!%p1793_p2), 1   ;;  %v790_v51 = vsub.f32 (!%p1793_p2), %v543_v48, %v542_v47  ;;  %v2320_v52 = vmov (!%p1793_p2), 0   ;;  %v2321_v53 = vmov (!%p1793_p2), 2  }
 0x114   : > { %2032 = vmatprep.subr.bf16.mxu1 (!%p1793_p2), %v2315_v28  ;;  %1910 = vmatprep.mubr.msk.f32.mxu1 (!%p1793_p2), %vm2316_vm4, %v2317_v31  ;;  %v551_v38 = vshrl.u32 (!%p1793_p2), %v550_v35, 7 }
 0x115   : > { %v2585_v32 = vld [vmem:[#allocation2] sm:$0xff] (!%p1793_p2)  ;;  %v546_v36 = vstv (!%p1793_p2), %s545_s19  ;;  %2193 = vset.pattern.permute.xlu1 (!%p1793_p2), %v2318_v49  ;;  %2191 = vset.pattern.permute.xlu0 (!%p1793_p2), %v2319_v50 }
 0x116   : > { %2028 = vmatpush3.bf16.msra.mxu0 (!%p1793_p2), %v2027_v30  ;;  %v547_v37 = vmul.f32 (!%p1793_p2), %v546_v36, %v2514_v10  ;;  %v552_v40 = vsub.s32 (!%p1793_p2), 0, %v551_v38  ;;  %819 = vperm.xlu1 (!%p1793_p2), %2193, %v790_v51  }
 0x117   : > { %2035 = vmatprep.subr.bf16.mxu0 (!%p1793_p2), %v2315_v28  ;;  %2034 = vmatpush3.bf16.msra.mxu1 (!%p1793_p2), %v2033_v33 }
 0x118   : > { %v548_v39 = vadd.f32 %v547_v37, %v2524_v12  ;;  %799 = vperm.xlu0 %2191, %v790_v51   ;;  %v634_v54 = vrot.slane %v2544_v16, %v552_v40  ;;  %v714_v59 = vrot.slane %v2569_v21, %v552_v40 }
 0x119   : > { %1900 = vmatmul.mubr.msk.f32.vlgmr.msra.gmra.mrb[0].mxu0 %vm555_vm5, %v2585_v32 }
 0x11a   : > { %1921 = vmatprep.mubr.msk.f32.mxu0 %vm2316_vm4, %v2317_v31  ;;  %2037 = vmatpush3.bf16.msra.mxu0 %v2036_v34  ;;  %v553_v41 = vrot.slane %v548_v39, %v552_v40 }
 0x11b   : > { %2038 = vmatprep.subr.bf16.mxu0 %v2315_v28  ;;  %2194 = vset.pattern.permute.xlu1 %v2320_v52 }
 0x11c   : > { %2192 = vset.pattern.permute.xlu0 %v2321_v53  ;;  %793 = vperm.xlu1 %2194, %v790_v51  }
 0x11d   : > { %809 = vperm.xlu0 %2192, %v790_v51  }
 0x11e   : > { %2040 = vmatpush3.bf16.msra.mxu0 %v2039_v46 }
 0x121   : > { %2195 = vset.pattern.permute.xlu0 %v2318_v49 }
 0x195   : > { %v820_v4 = vpop.permute.xlu1 %819 }
 0x197   : > { %v800_v63 = vpop.permute.xlu0 %799 }
 0x19b   : > { %v794_v22 = vpop.permute.xlu1 %793 }
 0x19c   : > { %v810_v0 = vpop.permute.xlu0 %809 }
 0x1ec   : > { %v625_v42 = vpop.f32.mrb[0].mxu0 }
 0x1ed   : > { %v626_v43 = vadd.f32 %v625_v42, %v553_v41  ;;  %v1901_v44 = vpop.f32.mrb[1].mxu0 }
 0x1ef   : > { %v629_v45 = vmax.f32 %v626_v43, 0.0 }
 0x1f1   : > { %1911 = vmatmul.mubr.msk.f32.vlgmr.msra.gmra.mrb[0].mxu1 %vm555_vm5, %v629_v45 }
 0x2c4   : > { %v705_v55 = vpop.f32.mrb[0].mxu1 }
 0x2c5   : > { %v706_v56 = vadd.f32 %v705_v55, %v634_v54  ;;  %v1912_v57 = vpop.f32.mrb[1].mxu1 }
 0x2c7   : > { %v709_v58 = vmax.f32 %v706_v56, 0.0 }
 0x2c9   : > { %1922 = vmatmul.mubr.msk.f32.vlgmr.msra.gmra.mrb[2].mxu0 %vm555_vm5, %v709_v58 }
 0x39c   : > { %v785_v60 = vpop.f32.mrb[2].mxu0 }
 0x39d   : > { %v786_v61 = vadd.f32 %v785_v60, %v714_v59  ;;  %v1923_v62 = vpop.f32.mrb[3].mxu0 }
 0x39f   : > { %2196 = vtanh.f32 %v786_v61 }
 0x3a9   : > { %v2197_v1 = vpop.eup %2196 }
 0x3aa   : > { %v802_v2 = vmul.f32 %v2197_v1, %v800_v63  ;;  %v812_v3 = vmul.f32 %v2197_v1, %v810_v0  ;;  %v822_v5 = vmul.f32 %v2197_v1, %v820_v4  ;;  %v796_v23 = vmul.f32 %v2197_v1, %v794_v22 }
 0x3ac   : > { %814 = vrot.lane.b32.xlu0 %v812_v3, %s2322_s23  ;;  %804 = vrot.lane.b32.xlu1 %v802_v2, %s2323_s26  ;;  %v797_v24 = vadd.f32 %v796_v23, %v2585_v32 }
 0x3b0   : > { %824 = vrot.lane.b32.xlu1 %v822_v5, %s2324_s28 }
 0x41e   : > { %v805_v25 = vpop.permute.xlu1 %804  ;;  %v815_v27 = vpop.permute.xlu0 %814 }
 0x41f   : > { %v807_v26 = vadd.f32 %v805_v25, %v797_v24 }
 0x421   : > { %v817_v28 = vadd.f32 %v815_v27, %v807_v26 }
 0x422   : > { %v825_v29 = vpop.permute.xlu1 %824 }
 0x423   : > { %v827_v30 = vadd.f32 %v825_v29, %v817_v28 }
 0x425   : > { %828 = vst.msk [vmem:[#allocation2] sm:$0xff] %vm555_vm5, %v827_v30  ;;  %829 = vst.msk [vmem:[%s2573_s30] sm:$0xff] %vm555_vm5, %v827_v30 }
 0x426 PF: > { %v2609_v31 = vpack.c.bf16 %v2499_v7, %v2494_v6  ;;  %v2325_v33 = vmov 0.0|0.0   ;;  %v2615_v32 = vpack.c.bf16 %v2529_v13, %v2519_v11  ;;  %v2620_v34 = vpack.c.bf16 %v2509_v9, %v2504_v8  ;;  %s834_s11 = scvt.s32.f32 %s2481_s24  ;;  %v831_v41 = vld [vmem:[%s2571_s29] sm:$0xff]  ;;  %v2670_v42 = vld [vmem:[%s2571_s29 + $0x8] sm:$0xff]  ;;  %s2332_s25 = smov 64   ;;  %v1804_v29 = vld [vmem:[%s2571_s29 + $0x10] sm:$0xff] }
 0x427   : > { %2041 = vmatprep.subr.bf16.mxu0 %v2325_v33  ;;  %2047 = vmatprep.subr.bf16.mxu1 %v2325_v33  ;;  %vm2326_vm6 = vmmov 0   ;;  %v2327_v35 = vmov 0.0   ;;  %vm845_vm7 = vcmask 261120   ;;  %v2639_v7 = vpack.c.bf16 %v2539_v15, %v2534_v14  ;;  %s2333_s21 = smov 96   ;;  %s2334_s0 = smov 32  }
 0x428   : > { %2043 = vmatpush3.bf16.msra.mxu0 %v2609_v31  ;;  %1932 = vmatprep.mubr.msk.f32.mxu0 %vm2326_vm6, %v2327_v35  ;;  %v2645_v8 = vpack.c.bf16 %v2554_v18, %v2549_v17  ;;  %s835_s22 = smul.f32 0.06666667, %s834_s11  ;;  %v840_v9 = vlaneseq  ;;  %v2664_v40 = vpack.c.bf16 %v2564_v20, %v2559_v19  ;;  %v2328_v43 = vmov 3   ;;  %s1120_s19 = sadd.s32 1, %s2481_s24 }
 0x429   : > { %2044 = vmatprep.subr.bf16.mxu0 %v2325_v33  ;;  %2049 = vmatpush3.bf16.msra.mxu1 %v2615_v32  ;;  %v2329_v44 = vmov 1   ;;  %v1080_v45 = vsub.f32 %v2670_v42, %v831_v41  ;;  %v2330_v46 = vmov 0   ;;  %v2331_v19 = vmov 2   ;;  %s1124_s23 = scvt.s32.f32 %s1120_s19  ;;  %s1397_s28 = sadd.s32 2, %s2481_s24 }
 0x42a   : > { %2050 = vmatprep.subr.bf16.mxu1 %v2325_v33  ;;  %1943 = vmatprep.mubr.msk.f32.mxu1 %vm2326_vm6, %v2327_v35  ;;  %v836_v11 = vstv %s835_s22  ;;  %v841_v14 = vshrl.u32 %v840_v9, 7  ;;  %v1357_v30 = vsub.f32 %v1804_v29, %v2670_v42  ;;  %s1401_s11 = scvt.s32.f32 %s1397_s28  ;;  %vm1676_vm8 = vcmask 31744   ;;  %s1823_s24 = sshll.u32 %s2295_s16, 3 }
 0x42b   : > { %v837_v13 = vmul.f32 %v836_v11, %v2514_v10  ;;  %2200 = vset.pattern.permute.xlu1 %v2328_v43  ;;  %2198 = vset.pattern.permute.xlu0 %v2329_v44  ;;  %s1125_s26 = smul.f32 0.06666667, %s1124_s23  ;;  %s1694_s23 = sshll.u32 %s2573_s30, 4  ;;  %s2768_s23 = int_to_ptr.vmem [resolvable:$true] %s1694_s23 }
 0x42c   : > { %2046 = vmatpush3.bf16.msra.mxu0 %v2620_v34  ;;  %v2630_v6 = vld [vmem:[#allocation2] sm:$0xff]  ;;  %v2652_v36 = vsub.s32 0, %v841_v14  ;;  %1109 = vperm.xlu1 %2200, %v1080_v45   ;;  %s1402_s22 = smul.f32 0.06666667, %s1401_s11  ;;  %s2775_s16 = scalar_lea.sflag [#allocation6], %s386_s13 }
 0x42d   : > { %2053 = vmatprep.subr.bf16.mxu0 %v2325_v33  ;;  %2052 = vmatpush3.bf16.msra.mxu1 %v2639_v7  ;;  %v838_v15 = vadd.f32 %v837_v13, %v2524_v12  ;;  %v1126_v5 = vstv %s1125_s26 }
 0x42e   : > { %2059 = vmatprep.subr.bf16.mxu1 %v2325_v33  ;;  %1089 = vperm.xlu0 %2198, %v1080_v45   ;;  %v2681_v20 = vrot.slane %v2544_v16, %v2652_v36  ;;  %v2693_v16 = vrot.slane %v2569_v21, %v2652_v36  ;;  %v1127_v22 = vmul.f32 %v1126_v5, %v2514_v10 }
 0x42f   : > { %1933 = vmatmul.mubr.msk.f32.vlgmr.msra.gmra.mrb[0].mxu0 %vm845_vm7, %v2630_v6  ;;  %v843_v17 = vrot.slane %v838_v15, %v2652_v36 }
 0x430   : > { %1954 = vmatprep.mubr.msk.f32.mxu0 %vm2326_vm6, %v2327_v35  ;;  %2055 = vmatpush3.bf16.msra.mxu0 %v2645_v8  ;;  %v1128_v23 = vadd.f32 %v1127_v22, %v2524_v12 }
 0x431   : > { %2056 = vmatprep.subr.bf16.mxu0 %v2325_v33  ;;  %2201 = vset.pattern.permute.xlu1 %v2330_v46 }
 0x432   : > { %2199 = vset.pattern.permute.xlu0 %v2331_v19  ;;  %1083 = vperm.xlu1 %2201, %v1080_v45   ;;  %v1133_v24 = vrot.slane %v1128_v23, %v2652_v36 }
 0x433   : > { %1099 = vperm.xlu0 %2199, %v1080_v45  }
 0x434   : > { %2058 = vmatpush3.bf16.msra.mxu0 %v2664_v40 }
 0x435   : > { %2065 = vmatprep.subr.bf16.mxu0 %v2325_v33 }
 0x436   : > { %2203 = vset.pattern.permute.xlu1 %v2331_v19 }
 0x437   : > { %2202 = vset.pattern.permute.xlu0 %v2329_v44 }
 0x4ab   : > { %v1110_v59 = vpop.permute.xlu1 %1109 }
 0x4ad   : > { %v1090_v54 = vpop.permute.xlu0 %1089 }
 0x4b1   : > { %v1084_v60 = vpop.permute.xlu1 %1083 }
 0x4b2   : > { %v1100_v55 = vpop.permute.xlu0 %1099 }
 0x502   : > { %v915_v18 = vpop.f32.mrb[0].mxu0 }
 0x503   : > { %v916_v37 = vadd.f32 %v915_v18, %v843_v17  ;;  %v1934_v38 = vpop.f32.mrb[1].mxu0 }
 0x505   : > { %v919_v39 = vmax.f32 %v916_v37, 0.0 }
 0x507   : > { %1944 = vmatmul.mubr.msk.f32.vlgmr.msra.gmra.mrb[0].mxu1 %vm845_vm7, %v919_v39 }
 0x508   : > { %2061 = vmatpush3.bf16.msra.mxu1 %v2609_v31  ;;  %1965 = vmatprep.mubr.msk.f32.mxu1 %vm2326_vm6, %v2327_v35 }
 0x509   : > { %2062 = vmatprep.subr.bf16.mxu1 %v2325_v33 }
 0x50c   : > { %2064 = vmatpush3.bf16.msra.mxu1 %v2620_v34 }
 0x50d   : > { %2071 = vmatprep.subr.bf16.mxu1 %v2325_v33 }
 0x5da   : > { %v995_v47 = vpop.f32.mrb[0].mxu1 }
 0x5db   : > { %v996_v48 = vadd.f32 %v995_v47, %v2681_v20  ;;  %v1945_v49 = vpop.f32.mrb[1].mxu1 }
 0x5dd   : > { %v999_v50 = vmax.f32 %v996_v48, 0.0 }
 0x5df   : > { %1955 = vmatmul.mubr.msk.f32.vlgmr.msra.gmra.mrb[2].mxu0 %vm845_vm7, %v999_v50  ;;  %v1403_v50 = vstv %s1402_s22 }
 0x5e0   : > { %2067 = vmatpush3.bf16.msra.mxu0 %v2615_v32  ;;  %1976 = vmatprep.mubr.msk.f32.mxu0 %vm2326_vm6, %v2327_v35 }
 0x5e1   : > { %2068 = vmatprep.subr.bf16.mxu0 %v2325_v33 }
 0x5e4   : > { %2070 = vmatpush3.bf16.msra.mxu0 %v2639_v7 }
 0x5e5   : > { %2077 = vmatprep.subr.bf16.mxu0 %v2325_v33 }
 0x6b2   : > { %v1075_v51 = vpop.f32.mrb[2].mxu0 }
 0x6b3   : > { %v1076_v52 = vadd.f32 %v1075_v51, %v2693_v16  ;;  %v1956_v53 = vpop.f32.mrb[3].mxu0  ;;  %v1404_v51 = vmul.f32 %v1403_v50, %v2514_v10 }
 0x6b5   : > { %2211 = vtanh.f32 %v1076_v52  ;;  %v1405_v52 = vadd.f32 %v1404_v51, %v2524_v12 }
 0x6b7   : > { %v1410_v53 = vrot.slane %v1405_v52, %v2652_v36 }
 0x6bf   : > { %v2212_v56 = vpop.eup %2211 }
 0x6c0   : > { %v1092_v57 = vmul.f32 %v2212_v56, %v1090_v54  ;;  %v1102_v58 = vmul.f32 %v2212_v56, %v1100_v55  ;;  %v1112_v21 = vmul.f32 %v2212_v56, %v1110_v59  ;;  %v1086_v61 = vmul.f32 %v2212_v56, %v1084_v60 }
 0x6c2   : > { %1104 = vrot.lane.b32.xlu0 %v1102_v58, %s2332_s25  ;;  %1094 = vrot.lane.b32.xlu1 %v1092_v57, %s2333_s21  ;;  %v1087_v62 = vadd.f32 %v1086_v61, %v2630_v6 }
 0x6c6   : > { %1114 = vrot.lane.b32.xlu1 %v1112_v21, %s2334_s0  ;;  %1366 = vperm.xlu0 %2202, %v1357_v30  }
 0x6ca   : > { %1376 = vperm.xlu1 %2203, %v1357_v30   ;;  %2205 = vset.pattern.permute.xlu0 %v2330_v46 }
 0x6cb   : > { %1360 = vperm.xlu0 %2205, %v1357_v30  }
 0x6ce   : > { %2204 = vset.pattern.permute.xlu1 %v2328_v43 }
 0x6cf   : > { %1386 = vperm.xlu1 %2204, %v1357_v30   ;;  %2207 = vset.pattern.permute.xlu0 %v2331_v19 }
 0x6d3   : > { %2206 = vset.pattern.permute.xlu1 %v2329_v44 }
 0x734   : > { %v1095_v63 = vpop.permute.xlu1 %1094  ;;  %v1105_v1 = vpop.permute.xlu0 %1104 }
 0x735   : > { %v1097_v0 = vadd.f32 %v1095_v63, %v1087_v62 }
 0x737   : > { %v1107_v2 = vadd.f32 %v1105_v1, %v1097_v0 }
 0x738   : > { %v1115_v3 = vpop.permute.xlu1 %1114 }
 0x739   : > { %v1117_v4 = vadd.f32 %v1115_v3, %v1107_v2 }
 0x73b   : > { %1802 = vst.msk [vmem:[%s2573_s30 + $0x8] sm:$0xff] %vm845_vm7, %v1117_v4  ;;  %1966 = vmatmul.mubr.msk.f32.vlgmr.msra.gmra.mrb[2].mxu1 %vm845_vm7, %v1117_v4 }
 0x73c   : > { %2073 = vmatpush3.bf16.msra.mxu1 %v2645_v8  ;;  %1987 = vmatprep.mubr.msk.f32.mxu1 %vm2326_vm6, %v2327_v35 }
 0x73d   : > { %2074 = vmatprep.subr.bf16.mxu1 %v2325_v33 }
 0x740   : > { %2076 = vmatpush3.bf16.msra.mxu1 %v2664_v40 }
 0x741   : > { %2083 = vmatprep.subr.bf16.mxu1 %v2325_v33 }
 0x745   : > { %v1367_v37 = vpop.permute.xlu0 %1366 }
 0x749   : > { %v1377_v15 = vpop.permute.xlu1 %1376 }
 0x74e   : > { %v1387_v17 = vpop.permute.xlu1 %1386 }
 0x80e   : > { %v1204_v25 = vpop.f32.mrb[2].mxu1 }
 0x80f   : > { %v1205_v26 = vadd.f32 %v1204_v25, %v1133_v24  ;;  %v1967_v27 = vpop.f32.mrb[3].mxu1 }
 0x811   : > { %v1208_v28 = vmax.f32 %v1205_v26, 0.0 }
 0x813   : > { %1977 = vmatmul.mubr.msk.f32.vlgmr.msra.gmra.mrb[4].mxu0 %vm845_vm7, %v1208_v28 }
 0x814   : > { %2079 = vmatpush3.bf16.msra.mxu0 %v2609_v31  ;;  %1998 = vmatprep.mubr.msk.f32.mxu0 %vm2326_vm6, %v2327_v35 }
 0x815   : > { %2080 = vmatprep.subr.bf16.mxu0 %v2325_v33 }
 0x818   : > { %2082 = vmatpush3.bf16.msra.mxu0 %v2620_v34 }
 0x819   : > { %2089 = vmatprep.subr.bf16.mxu0 %v2325_v33 }
 0x8e6   : > { %v1278_v31 = vpop.f32.mrb[4].mxu0 }
 0x8e7   : > { %v1279_v34 = vadd.f32 %v1278_v31, %v2681_v20  ;;  %v1978_v6 = vpop.f32.mrb[5].mxu0 }
 0x8e9   : > { %v1282_v9 = vmax.f32 %v1279_v34, 0.0 }
 0x8eb   : > { %1988 = vmatmul.mubr.msk.f32.vlgmr.msra.gmra.mrb[4].mxu1 %vm845_vm7, %v1282_v9 }
 0x8ec   : > { %2085 = vmatpush3.bf16.msra.mxu1 %v2615_v32  ;;  %2009 = vmatprep.mubr.msk.f32.mxu1 %vm2326_vm6, %v2327_v35 }
 0x8ed   : > { %2086 = vmatprep.subr.bf16.mxu1 %v2325_v33 }
 0x8f0   : > { %2088 = vmatpush3.bf16.msra.mxu1 %v2639_v7  ;;  %v1361_v7 = vpop.permute.xlu0 %1360 }
 0x9be   : > { %v1352_v11 = vpop.f32.mrb[4].mxu1 }
 0x9bf   : > { %v1353_v13 = vadd.f32 %v1352_v11, %v2693_v16  ;;  %v1989_v14 = vpop.f32.mrb[5].mxu1 }
 0x9c1   : > { %2213 = vtanh.f32 %v1353_v13 }
 0x9cb   : > { %v2214_v18 = vpop.eup %2213 }
 0x9cc   : > { %v1369_v38 = vmul.f32 %v2214_v18, %v1367_v37  ;;  %v1389_v39 = vmul.f32 %v2214_v18, %v1387_v17  ;;  %v1379_v32 = vmul.f32 %v2214_v18, %v1377_v15  ;;  %v1363_v41 = vmul.f32 %v2214_v18, %v1361_v7 }
 0x9ce   : > { %1391 = vrot.lane.b32.xlu0 %v1389_v39, %s2334_s0  ;;  %1371 = vrot.lane.b32.xlu1 %v1369_v38, %s2333_s21  ;;  %v1364_v44 = vadd.f32 %v1363_v41, %v1117_v4 }
 0x9d2   : > { %1381 = vrot.lane.b32.xlu1 %v1379_v32, %s2332_s25 }
 0xa40   : > { %v1372_v42 = vpop.permute.xlu1 %1371  ;;  %v1392_v48 = vpop.permute.xlu0 %1391 }
 0xa41   : > { %v1374_v45 = vadd.f32 %v1372_v42, %v1364_v44 }
 0xa44   : > { %v1382_v19 = vpop.permute.xlu1 %1381 }
 0xa45   : > { %v1384_v47 = vadd.f32 %v1382_v19, %v1374_v45 }
 0xa47   : > { %v1394_v49 = vadd.f32 %v1392_v48, %v1384_v47 }
 0xa49   : > { %1808 = vst.msk [vmem:[%s2573_s30 + $0x10] sm:$0xff] %vm845_vm7, %v1394_v49  ;;  %1999 = vmatmul.mubr.msk.f32.vlgmr.msra.gmra.mrb[6].mxu0 %vm845_vm7, %v1394_v49 }
 0xa4a   : > { %2091 = vmatpush3.bf16.msra.mxu0 %v2645_v8  ;;  %2020 = vmatprep.mubr.msk.f32.mxu0 %vm2326_vm6, %v2327_v35  ;;  %v1810_v35 = vld [vmem:[%s2571_s29 + $0x18] sm:$0xff]  ;;  %s1691_s29 = sadd.s32 %s2299_s17, %s1823_s24  ;;  %s2217_s17 = scalar_lea.vmem %s2768_s23, 512 }
 0xa4b   : > { %2092 = vmatprep.subr.bf16.mxu0 %v2325_v33  ;;  %v1634_v33 = vsub.f32 %v1810_v35, %v1804_v29  ;;  %1677 = vst.msk [vmem:[#allocation3] sm:$0xff] %vm1676_vm8, %v1810_v35  ;;  %s1819_s19 = sshll.u32 %s1691_s29, 7  ;;  %p2218_p3 = scmp.ne.s32.totalorder %s2768_s23, %s2217_s17 }
 0xa4c   : > { %s2766_s26 = scalar_lea.hbm %s2837_s10, %s1819_s19 }
 0xa4d   : > { %1643 = vperm.xlu1 %2206, %v1634_v33   ;;  %1653 = vperm.xlu0 %2207, %v1634_v33   ;;  %p2219_p4 = pnand %p2218_p3, %p2454_p8 }
 0xa4e   : > { %2094 = vmatpush3.bf16.msra.mxu0 %v2664_v40 }
 0xa4f   : > { %p2220_p5 = pneg %p2219_p4 }
 0xa51   : > { %2208 = vset.pattern.permute.xlu1 %v2328_v43  ;;  %2210 = vset.pattern.permute.xlu0 %v2328_v43 }
 0xa52   : > { %1663 = vperm.xlu1 %2208, %v1634_v33  }
 0xa56   : > { %2209 = vset.pattern.permute.xlu1 %v2330_v46 }
 0xa57   : > { %1637 = vperm.xlu1 %2209, %v1634_v33  }
 0xacc   : > { %v1644_v43 = vpop.permute.xlu1 %1643  ;;  %v1654_v21 = vpop.permute.xlu0 %1653 }
 0xb1c   : > { %v1481_v54 = vpop.f32.mrb[6].mxu0 }
 0xb1d   : > { %v1482_v8 = vadd.f32 %v1481_v54, %v1410_v53  ;;  %v2000_v55 = vpop.f32.mrb[7].mxu0 }
 0xb1f   : > { %v1485_v56 = vmax.f32 %v1482_v8, 0.0 }
 0xb21   : > { %2010 = vmatmul.mubr.msk.f32.vlgmr.msra.gmra.mrb[6].mxu1 %vm845_vm7, %v1485_v56 }
 0xbf4   : > { %v1555_v10 = vpop.f32.mrb[6].mxu1 }
 0xbf5   : > { %v1556_v12 = vadd.f32 %v1555_v10, %v2681_v20  ;;  %v2011_v36 = vpop.f32.mrb[7].mxu1  ;;  %v1664_v20 = vpop.permute.xlu1 %1663 }
 0xbf7   : > { %v1559_v40 = vmax.f32 %v1556_v12, 0.0 }
 0xbf9   : > { %2021 = vmatmul.mubr.msk.f32.vlgmr.msra.gmra.mrb[8].mxu0 %vm845_vm7, %v1559_v40 }
 0xccc   : > { %v1629_v57 = vpop.f32.mrb[8].mxu0 }
 0xccd   : > { %v1630_v58 = vadd.f32 %v1629_v57, %v2693_v16  ;;  %v2022_v59 = vpop.f32.mrb[9].mxu0  ;;  %v1638_v16 = vpop.permute.xlu1 %1637 }
 0xccf   : > { %2215 = vtanh.f32 %v1630_v58 }
 0xcd9   : > { %v2216_v46 = vpop.eup %2215 }
 0xcda   : > { %v1646_v60 = vmul.f32 %v2216_v46, %v1644_v43  ;;  %v1656_v61 = vmul.f32 %v2216_v46, %v1654_v21  ;;  %v1666_v62 = vmul.f32 %v2216_v46, %v1664_v20  ;;  %v1640_v63 = vmul.f32 %v2216_v46, %v1638_v16 }
 0xcdc   : > { %1658 = vrot.lane.b32.xlu1 %v1656_v61, %s2332_s25  ;;  %1648 = vrot.lane.b32.xlu0 %v1646_v60, %s2333_s21  ;;  %v1641_v0 = vadd.f32 %v1640_v63, %v1394_v49 }
 0xce0   : > { %1668 = vrot.lane.b32.xlu0 %v1666_v62, %s2334_s0  ;;  %s2335_s0 = smov [#allocation5]  }
 0xce1   : > { %s2221_s28 = sshll.u32 %s2335_s0, 4  ;;  %s2222_s28 = int_to_ptr.vmem [resolvable:$false] %s2221_s28 }
 0xce2   : > { %s2223_s11 = scalar_lea.vmem %s2222_s28, 1024  ;;  %p2224_p6 = scmp.lt.s32.totalorder %s2768_s23, %s2222_s28 }
 0xce3   : > { %p2225_p7 = scmp.lt.s32.totalorder %s2223_s11, %s2217_s17 }
 0xce5   : > { %p2226_p10 = por %p2225_p7, %p2224_p6 }
 0xce7   : > { %p2227_p11 = pnand %p2226_p10, %p2220_p5 }
 0xd4e   : > { %v1649_v1 = vpop.permute.xlu0 %1648  ;;  %v1659_v3 = vpop.permute.xlu1 %1658 }
 0xd4f   : > { %v1651_v2 = vadd.f32 %v1649_v1, %v1641_v0 }
 0xd51   : > { %v1661_v4 = vadd.f32 %v1659_v3, %v1651_v2 }
 0xd52   : > { %v1669_v5 = vpop.permute.xlu0 %1668 }
 0xd53   : > { %v1671_v22 = vadd.f32 %v1669_v5, %v1661_v4 }
 0xd55   : > { %1814 = vst.msk [vmem:[%s2573_s30 + $0x18] sm:$0xff] %vm845_vm7, %v1671_v22  ;;  %1674 = vst.msk [vmem:[#allocation2] sm:$0xff] %vm845_vm7, %v1671_v22 }
 0xd56   : > { %2230 = shalt.err (!%p2227_p11)
}
 0xd57   : > { %s2231_s13 = scalar_lea.hbm %s2766_s26, 512  ;;  %s2235_s24 = scalar_lea.hbm %s2837_s10, 4096 }
 0xd58   : > { %p2232_p12 = scmp.ne.s32.totalorder %s2766_s26, %s2231_s13  ;;  %p2236_p1 = scmp.lt.u32.totalorder %s2766_s26, %s2837_s10 }
 0xd59   : > { %p2237_p2 = scmp.lt.u32.totalorder %s2235_s24, %s2231_s13  ;;  %p2239_p4 = scmp.lt.u32.totalorder %s2231_s13, %s2766_s26 }
 0xd5a   : > { %p2233_p13 = pnand %p2232_p12, %p2454_p8 }
 0xd5b   : > { %p2238_p3 = por %p2237_p2, %p2236_p1 }
 0xd5c   : > { %p2234_p0 = pneg %p2233_p13 }
 0xd5d   : > { %p2240_p5 = por %p2239_p4, %p2238_p3 }
 0xd5f   : > { %p2241_p6 = pnand %p2240_p5, %p2234_p0 }
 0xd61   : > { %2244 = shalt.err (!%p2241_p6)
}
 0xd62   : > { %s2336_s25 = smov 128   ;;  %s2337_s21 = smov 256  }
 0xd63   : > { %s2338_s17 = smov 8  }
 0xd64   : > { %2095 = dma.vmem_to_hbm [thread:$0]  (%p2454_p8), %s2768_s23, 512, %s2766_s26, %s2775_s16, %s2336_s25, %s2337_s21, %s2338_s17  }
 0xd65 PF: > { %s2853_s0 = sld [smem:[#allocation8_spill]]  ;;  %p2101_p7 = scmp.ge.s32.totalorder %s2311_s20, 2 }
 0xd67   : > { %p2098_p10 = pnand %p2101_p7, %p2458_p9 }
 0xd6b   : > { %s1709_s11 = sand.u32 1, %s2853_s0  }
 0xd6c   : > { %s1710_s13 = scalar_lea.sflag [#allocation6], %s1709_s11 }
 0xd6d   : > { %2278 = dma.done.wait (!%p2098_p10), %s1710_s13, 512  }
 0xd6e   : > { %2280 = vsyncadd (!%p2098_p10), %s1710_s13, 4294966784  ;;  %s23_s20 = sadd.s32 1, %s2311_s20   ;;  %s2855_s17 = sld [smem:[#allocation9_spill]] }
 0xd6f   : > { %p20_p11 = scmp.ge.s32.totalorder %s23_s20, 10   ;;  %s2856_s27 = sld [smem:[#allocation10_spill]] }
 0xd70   : > { %s2857_s19 = sld [smem:[#allocation11_spill]]  ;;  %s2858_s13 = smov %s2287_s14 }
 0xd71   : > { %s2859_s14 = smov %s2291_s15  ;;  %s2860_s15 = smov %s2466_s12 }
 0xd72   : > { %s2861_s16 = smov %s2303_s18  ;;  %22 = sbr.rel (!%p20_p11) target bundleno = 7 (0x7), region = 152 }
 0xd75   : > { %s2862_s18 = smov %s2856_s27 }
 0xd79   :  { %1715 = vsyncpa [#allocation6], 1 }
 0xd7a   :  { %1717 = vsyncpa [#allocation6 + $0x1], 1 }

</bundles_post_ra>
